<compile_context>
chip_gen: v6e
topology: v6e:2x2x1
jax: 0.10.0
libtpu: 0.0.40
codegen_flags: <defaults>
</compile_context>

<pallas_src>
import math

import jax
import jax.numpy as jnp
from jax.experimental import pallas as pl
from jax.experimental.pallas import tpu as pltpu

OUT_PAD = 128   # lane-dense padded width of the final layer (real width = 10)
N_CLASSES = 10


def mlp_kernel(x_ref,
               w1_ref, b1_ref,
               w2_ref, b2_ref,
               w3_ref, b3_ref,
               w4_ref, b4_ref,
               o_ref):
    # x streamed as f32; cast to bf16 in-kernel (hidden under the DMA).
    x = x_ref[...].astype(jnp.bfloat16)                              # (TB, 256)

    # fc1 + relu
    h = jnp.dot(x, w1_ref[...], preferred_element_type=jnp.float32) + b1_ref[...]
    h = jnp.maximum(h, 0.0).astype(jnp.bfloat16)

    # fc2 + relu
    h = jnp.dot(h, w2_ref[...], preferred_element_type=jnp.float32) + b2_ref[...]
    h = jnp.maximum(h, 0.0).astype(jnp.bfloat16)

    # fc3 + sigmoid (f32 elementwise -> EUP; safe on v5e which has no bf16 VPU/EUP)
    h = jnp.dot(h, w3_ref[...], preferred_element_type=jnp.float32) + b3_ref[...]
    h = jax.nn.sigmoid(h).astype(jnp.bfloat16)

    # fc4 (padded to 128 lanes -> unmasked lane-dense store), stored bf16.
    y = jnp.dot(h, w4_ref[...], preferred_element_type=jnp.float32) + b4_ref[...]
    o_ref[...] = y.astype(o_ref.dtype)


def _round_up(n, m):
    return ((n + m - 1) // m) * m


def _prep_params(params):
    """Cast weights to bf16, keep biases f32, zero-pad fc4 to OUT_PAD lanes."""
    (w1, b1), (w2, b2), (w3, b3), (w4, b4) = params
    w4p = jnp.zeros((w4.shape[0], OUT_PAD), jnp.float32).at[:, :N_CLASSES].set(w4)
    b4p = jnp.zeros((1, OUT_PAD), jnp.float32).at[:, :N_CLASSES].set(b4)
    ws = [w1, w2, w3, w4p]
    bs = [b1, b2, b3, b4p]
    flat = []
    for w, b in zip(ws, bs):
        flat += [w.astype(jnp.bfloat16), b.astype(jnp.float32)]
    return flat


def _choose_tb(batch, tb_max):
    """Pick a batch tile.

    batch <= tb_max : one whole-array block (legal for any shape, no ragged
                      reads at all).
    batch >  tb_max : tile is a multiple of 256 (MXU M on v6e/v7x, also fine
                      on v5e's 4x128x128), chosen so the grid length is even
                      (clean 2-TensorCore split on v7x).
    """
    if batch <= tb_max:
        return batch
    n = pl.cdiv(batch, tb_max)
    if n % 2:
        n += 1
    return min(tb_max, _round_up(pl.cdiv(batch, n), 256))


def fully_connected_nn(x, params, *, tb=2048, out_dtype=jnp.bfloat16):
    """Forward pass. x: (batch, 256) f32. params: list of 4 (W, b) pairs."""
    batch, d_in = x.shape
    assert d_in == 256

    tb = _choose_tb(batch, tb)
    grid = (pl.cdiv(batch, tb),)

    flat_params = _prep_params(params)

    # Resident weights/biases: constant index_map -> loaded once, never re-DMA'd.
    def const_map(shape):
        return pl.BlockSpec(shape, lambda i: (0, 0))

    w_shapes = [(256, 128), (1, 128),
                (128, 64), (1, 64),
                (64, 32), (1, 32),
                (32, OUT_PAD), (1, OUT_PAD)]

    in_specs = [pl.BlockSpec((tb, 256), lambda i: (i, 0))]
    in_specs += [const_map(s) for s in w_shapes]

    flops_per_row = 2 * (256 * 128 + 128 * 64 + 64 * 32 + 32 * OUT_PAD)
    weight_bytes = sum(a * b for a, b in w_shapes[::2]) * 2 \
        + sum(a * b for a, b in w_shapes[1::2]) * 4
    out_bytes = jnp.dtype(out_dtype).itemsize
    cost = pl.CostEstimate(
        flops=batch * flops_per_row,
        transcendentals=batch * 32 * 2,                    # sigmoid: exp + recip / elem
        bytes_accessed=batch * (256 * 4 + OUT_PAD * out_bytes) + weight_bytes,
    )

    out = pl.pallas_call(
        mlp_kernel,
        out_shape=jax.ShapeDtypeStruct((batch, OUT_PAD), out_dtype),
        grid=grid,
        in_specs=in_specs,
        out_specs=pl.BlockSpec((tb, OUT_PAD), lambda i: (i, 0)),
        compiler_params=pltpu.CompilerParams(
            dimension_semantics=("parallel",)),
        cost_estimate=cost,
    )(x, *flat_params)

    # Consumers that can read the padded (batch, 128) block directly should do
    # so and skip this slice (it lowers to a small copy kernel).
    return out[:, :N_CLASSES]


def init_params(key, mode="effective"):
    """Deterministic init matching FullyConnectedNN.initialize_parameters.

    Weights are (in_features, out_features) = PyTorch weight^T; biases zero.
    """
    dims = [(256, 128), (128, 64), (64, 32), (32, 10)]
    params = []
    for (fan_in, fan_out) in dims:
        key, wk = jax.random.split(key)
        if mode == "slow":
            w = jax.random.uniform(wk, (fan_in, fan_out), jnp.float32,
                                   minval=-1e-4, maxval=1e-4)
        elif mode == "effective":
            # kaiming_uniform_(nonlinearity='relu'): bound = sqrt(6 / fan_in)
            bound = math.sqrt(6.0 / fan_in)
            w = jax.random.uniform(wk, (fan_in, fan_out), jnp.float32,
                                   minval=-bound, maxval=bound)
        elif mode == "fast":
            w = jax.random.normal(wk, (fan_in, fan_out), jnp.float32)
        else:
            raise ValueError(mode)
        b = jnp.zeros((1, fan_out), jnp.float32)
        params.append((w, b))
    return params


def reference_forward(x, params):
    """Pure-JAX reference mirroring the kernel's bf16-input / f32-accum math."""
    (w1, b1), (w2, b2), (w3, b3), (w4, b4) = params
    xb = x.astype(jnp.bfloat16)

    def dot(a, w):
        return jnp.dot(a, w.astype(jnp.bfloat16),
                       preferred_element_type=jnp.float32)

    h = jnp.maximum(dot(xb, w1) + b1, 0.0).astype(jnp.bfloat16)
    h = jnp.maximum(dot(h, w2) + b2, 0.0).astype(jnp.bfloat16)
    h = jax.nn.sigmoid(dot(h, w3) + b3).astype(jnp.bfloat16)
    return dot(h, w4) + b4


if __name__ == "__main__":
    key = jax.random.PRNGKey(0)
    key, xk = jax.random.split(key)

    batch = 8
    x = jax.random.normal(xk, (batch, 256), jnp.float32)

    params = init_params(key, mode="effective")

    out = fully_connected_nn(x, params)
    out = jax.block_until_ready(out)
    assert out.shape == (batch, N_CLASSES), out.shape

    # Reference through the same bf16/f32-accum path, with the kernel's final
    # bf16 store applied so the comparison is like-for-like.
    ref = reference_forward(x, params).astype(out.dtype).astype(jnp.float32)
    out_f32 = out.astype(jnp.float32)
    assert jnp.allclose(out_f32, ref, atol=2e-2, rtol=2e-2), \
        f"max abs err {jnp.max(jnp.abs(out_f32 - ref))}"

    print("KERNEL_OK")
</pallas_src>

<mosaic_0001>
module attributes {stable_mosaic.version = 11 : i64} {
  func.func @mlp_kernel(%arg0: i32, %arg1: memref<8x256xf32, #tpu.memory_space<vmem>>, %arg2: memref<256x128xbf16, #tpu.memory_space<vmem>>, %arg3: memref<1x128xf32, #tpu.memory_space<vmem>>, %arg4: memref<128x64xbf16, #tpu.memory_space<vmem>>, %arg5: memref<1x64xf32, #tpu.memory_space<vmem>>, %arg6: memref<64x32xbf16, #tpu.memory_space<vmem>>, %arg7: memref<1x32xf32, #tpu.memory_space<vmem>>, %arg8: memref<32x128xbf16, #tpu.memory_space<vmem>>, %arg9: memref<1x128xf32, #tpu.memory_space<vmem>>, %arg10: memref<8x128xbf16, #tpu.memory_space<vmem>>) attributes {dimension_semantics = [#tpu.dimension_semantics<parallel>], iteration_bounds = array<i64: 1>, scalar_prefetch = 0 : i64, scratch_operands = 0 : i64, tpu.core_type = #tpu.core_type<tc>, window_params = [{transform_indices = @transform_0, window_bounds = array<i64: 8, 256>}, {pipeline_mode = #tpu.pipeline_mode<synchronous>, transform_indices = @transform_1, window_bounds = array<i64: 256, 128>}, {pipeline_mode = #tpu.pipeline_mode<synchronous>, transform_indices = @transform_2, window_bounds = array<i64: 1, 128>}, {pipeline_mode = #tpu.pipeline_mode<synchronous>, transform_indices = @transform_3, window_bounds = array<i64: 128, 64>}, {pipeline_mode = #tpu.pipeline_mode<synchronous>, transform_indices = @transform_4, window_bounds = array<i64: 1, 64>}, {pipeline_mode = #tpu.pipeline_mode<synchronous>, transform_indices = @transform_5, window_bounds = array<i64: 64, 32>}, {pipeline_mode = #tpu.pipeline_mode<synchronous>, transform_indices = @transform_6, window_bounds = array<i64: 1, 32>}, {pipeline_mode = #tpu.pipeline_mode<synchronous>, transform_indices = @transform_7, window_bounds = array<i64: 32, 128>}, {pipeline_mode = #tpu.pipeline_mode<synchronous>, transform_indices = @transform_8, window_bounds = array<i64: 1, 128>}, {transform_indices = @transform_9, window_bounds = array<i64: 8, 128>}]} {
    %c0 = arith.constant 0 : index
    %c0_0 = arith.constant 0 : index
    %0 = vector.load %arg1[%c0, %c0_0] : memref<8x256xf32, #tpu.memory_space<vmem>>, vector<8x256xf32>
    %1 = arith.truncf %0 : vector<8x256xf32> to vector<8x256xbf16>
    %c0_1 = arith.constant 0 : index
    %c0_2 = arith.constant 0 : index
    %2 = vector.load %arg2[%c0_1, %c0_2] : memref<256x128xbf16, #tpu.memory_space<vmem>>, vector<256x128xbf16>
    %cst = arith.constant dense<0.000000e+00> : vector<8x128xf32>
    %3 = tpu.matmul %1, %2, %cst {dimension_numbers = #tpu.dot_dimension_numbers<[1], [0], [0], [1], [0, 0, 1, 1], [], []>} : vector<8x256xbf16>, vector<256x128xbf16>, vector<8x128xf32> -> vector<8x128xf32>
    %c0_3 = arith.constant 0 : index
    %c0_4 = arith.constant 0 : index
    %4 = vector.load %arg3[%c0_3, %c0_4] : memref<1x128xf32, #tpu.memory_space<vmem>>, vector<1x128xf32>
    %5 = vector.broadcast %4 : vector<1x128xf32> to vector<8x128xf32>
    %6 = arith.addf %3, %5 : vector<8x128xf32>
    %cst_5 = arith.constant 0.000000e+00 : f32
    %7 = vector.broadcast %cst_5 : f32 to vector<8x128xf32>
    %8 = arith.maximumf %6, %7 : vector<8x128xf32>
    %9 = arith.truncf %8 : vector<8x128xf32> to vector<8x128xbf16>
    %c0_6 = arith.constant 0 : index
    %c0_7 = arith.constant 0 : index
    %10 = vector.load %arg4[%c0_6, %c0_7] : memref<128x64xbf16, #tpu.memory_space<vmem>>, vector<128x64xbf16>
    %cst_8 = arith.constant dense<0.000000e+00> : vector<8x64xf32>
    %11 = tpu.matmul %9, %10, %cst_8 {dimension_numbers = #tpu.dot_dimension_numbers<[1], [0], [0], [1], [0, 0, 1, 1], [], []>} : vector<8x128xbf16>, vector<128x64xbf16>, vector<8x64xf32> -> vector<8x64xf32>
    %c0_9 = arith.constant 0 : index
    %c0_10 = arith.constant 0 : index
    %12 = vector.load %arg5[%c0_9, %c0_10] : memref<1x64xf32, #tpu.memory_space<vmem>>, vector<1x64xf32>
    %13 = vector.broadcast %12 : vector<1x64xf32> to vector<8x64xf32>
    %14 = arith.addf %11, %13 : vector<8x64xf32>
    %cst_11 = arith.constant 0.000000e+00 : f32
    %15 = vector.broadcast %cst_11 : f32 to vector<8x64xf32>
    %16 = arith.maximumf %14, %15 : vector<8x64xf32>
    %17 = arith.truncf %16 : vector<8x64xf32> to vector<8x64xbf16>
    %c0_12 = arith.constant 0 : index
    %c0_13 = arith.constant 0 : index
    %18 = vector.load %arg6[%c0_12, %c0_13] : memref<64x32xbf16, #tpu.memory_space<vmem>>, vector<64x32xbf16>
    %cst_14 = arith.constant dense<0.000000e+00> : vector<8x32xf32>
    %19 = tpu.matmul %17, %18, %cst_14 {dimension_numbers = #tpu.dot_dimension_numbers<[1], [0], [0], [1], [0, 0, 1, 1], [], []>} : vector<8x64xbf16>, vector<64x32xbf16>, vector<8x32xf32> -> vector<8x32xf32>
    %c0_15 = arith.constant 0 : index
    %c0_16 = arith.constant 0 : index
    %20 = vector.load %arg7[%c0_15, %c0_16] : memref<1x32xf32, #tpu.memory_space<vmem>>, vector<1x32xf32>
    %21 = vector.broadcast %20 : vector<1x32xf32> to vector<8x32xf32>
    %22 = arith.addf %19, %21 : vector<8x32xf32>
    %23 = arith.negf %22 : vector<8x32xf32>
    %24 = math.exp %23 : vector<8x32xf32>
    %cst_17 = arith.constant 1.000000e+00 : f32
    %25 = vector.broadcast %cst_17 : f32 to vector<8x32xf32>
    %26 = arith.addf %25, %24 : vector<8x32xf32>
    %27 = arith.divf %25, %26 : vector<8x32xf32>
    %28 = arith.truncf %27 : vector<8x32xf32> to vector<8x32xbf16>
    %c0_18 = arith.constant 0 : index
    %c0_19 = arith.constant 0 : index
    %29 = vector.load %arg8[%c0_18, %c0_19] : memref<32x128xbf16, #tpu.memory_space<vmem>>, vector<32x128xbf16>
    %cst_20 = arith.constant dense<0.000000e+00> : vector<8x128xf32>
    %30 = tpu.matmul %28, %29, %cst_20 {dimension_numbers = #tpu.dot_dimension_numbers<[1], [0], [0], [1], [0, 0, 1, 1], [], []>} : vector<8x32xbf16>, vector<32x128xbf16>, vector<8x128xf32> -> vector<8x128xf32>
    %c0_21 = arith.constant 0 : index
    %c0_22 = arith.constant 0 : index
    %31 = vector.load %arg9[%c0_21, %c0_22] : memref<1x128xf32, #tpu.memory_space<vmem>>, vector<1x128xf32>
    %32 = vector.broadcast %31 : vector<1x128xf32> to vector<8x128xf32>
    %33 = arith.addf %30, %32 : vector<8x128xf32>
    %34 = arith.truncf %33 : vector<8x128xf32> to vector<8x128xbf16>
    %c0_23 = arith.constant 0 : index
    %c0_24 = arith.constant 0 : index
    %35 = vector.load %arg10[%c0_23, %c0_24] : memref<8x128xbf16, #tpu.memory_space<vmem>>, vector<8x128xbf16>
    tpu.vector_store %arg10[%c0_23, %c0_24], %34 {strides = array<i32>} : memref<8x128xbf16, #tpu.memory_space<vmem>>, vector<8x128xbf16>,
    return
  }
  func.func @transform_0(%arg0: i32) -> (i32, i32) {
    %c0_i32 = arith.constant 0 : i32
    %c0_i32_0 = arith.constant 0 : i32
    return %arg0, %c0_i32 : i32, i32
  }
  func.func @transform_1(%arg0: i32) -> (i32, i32) {
    %c0_i32 = arith.constant 0 : i32
    %c0_i32_0 = arith.constant 0 : i32
    %c0_i32_1 = arith.constant 0 : i32
    return %c0_i32, %c0_i32_0 : i32, i32
  }
  func.func @transform_2(%arg0: i32) -> (i32, i32) {
    %c0_i32 = arith.constant 0 : i32
    %c0_i32_0 = arith.constant 0 : i32
    %c0_i32_1 = arith.constant 0 : i32
    return %c0_i32, %c0_i32_0 : i32, i32
  }
  func.func @transform_3(%arg0: i32) -> (i32, i32) {
    %c0_i32 = arith.constant 0 : i32
    %c0_i32_0 = arith.constant 0 : i32
    %c0_i32_1 = arith.constant 0 : i32
    return %c0_i32, %c0_i32_0 : i32, i32
  }
  func.func @transform_4(%arg0: i32) -> (i32, i32) {
    %c0_i32 = arith.constant 0 : i32
    %c0_i32_0 = arith.constant 0 : i32
    %c0_i32_1 = arith.constant 0 : i32
    return %c0_i32, %c0_i32_0 : i32, i32
  }
  func.func @transform_5(%arg0: i32) -> (i32, i32) {
    %c0_i32 = arith.constant 0 : i32
    %c0_i32_0 = arith.constant 0 : i32
    %c0_i32_1 = arith.constant 0 : i32
    return %c0_i32, %c0_i32_0 : i32, i32
  }
  func.func @transform_6(%arg0: i32) -> (i32, i32) {
    %c0_i32 = arith.constant 0 : i32
    %c0_i32_0 = arith.constant 0 : i32
    %c0_i32_1 = arith.constant 0 : i32
    return %c0_i32, %c0_i32_0 : i32, i32
  }
  func.func @transform_7(%arg0: i32) -> (i32, i32) {
    %c0_i32 = arith.constant 0 : i32
    %c0_i32_0 = arith.constant 0 : i32
    %c0_i32_1 = arith.constant 0 : i32
    return %c0_i32, %c0_i32_0 : i32, i32
  }
  func.func @transform_8(%arg0: i32) -> (i32, i32) {
    %c0_i32 = arith.constant 0 : i32
    %c0_i32_0 = arith.constant 0 : i32
    %c0_i32_1 = arith.constant 0 : i32
    return %c0_i32, %c0_i32_0 : i32, i32
  }
  func.func @transform_9(%arg0: i32) -> (i32, i32) {
    %c0_i32 = arith.constant 0 : i32
    %c0_i32_0 = arith.constant 0 : i32
    return %arg0, %c0_i32 : i32, i32
  }
}

</mosaic_0001>

<bundles_post_ra>
// kernel: tpu_custom_call.1
= control target key start
LH: loop header
LB: loop body
LE: loop exit
PB: predicated region body
PF: predicated region fallthrough
CT: control target
= control target key end

     0   :  { %14 = vsyncpa [#allocation3], 0  ;;  %s900_s0 = inlined_call_operand.vmem [shape: f32[8,256], index: 0, kind: input, shape index: {}]   ;;  %s901_s1 = inlined_call_operand.vmem [shape: bf16[256,128], index: 1, kind: input, shape index: {}]   ;;  %s902_s2 = inlined_call_operand.vmem [shape: f32[1,128], index: 2, kind: input, shape index: {}]   ;;  %s903_s3 = inlined_call_operand.vmem [shape: bf16[128,64], index: 3, kind: input, shape index: {}]   ;;  %s904_s4 = inlined_call_operand.vmem [shape: f32[1,64], index: 4, kind: input, shape index: {}]   ;;  %s905_s5 = inlined_call_operand.vmem [shape: bf16[64,32], index: 5, kind: input, shape index: {}]   ;;  %s906_s6 = inlined_call_operand.vmem [shape: f32[1,32], index: 6, kind: input, shape index: {}]   ;;  %s907_s7 = inlined_call_operand.hbm [shape: bf16[32,128], index: 7, kind: input, shape index: {}]   ;;  %s908_s8 = inlined_call_operand.vmem [shape: f32[1,128], index: 8, kind: input, shape index: {}]   ;;  %s909_s9 = inlined_call_operand.hbm [shape: bf16[8,128], index: 9, kind: output, shape index: {}]  }
   0x1   :  { %15 = vsyncpa [#allocation4], 0  ;;  %s716_s30 = smov [#allocation2]  }
   0x2   :  { %s35_s10 = sshll.u32 %s716_s30, 4  ;;  %s36_s10 = int_to_ptr.vmem [resolvable:$true] %s35_s10 }
   0x3   :  { %s680_s11 = scalar_lea.vmem %s36_s10, 256  ;;  %p685_p1 = scmp.lt.s32.totalorder %s36_s10, %s36_s10 }
   0x4   :  { %p681_p0 = scmp.ne.s32.totalorder %s36_s10, %s680_s11  ;;  %p686_p2 = scmp.lt.s32.totalorder %s680_s11, %s680_s11 }
   0x6   :  { %p687_p3 = por %p686_p2, %p685_p1 }
   0x8   :  { %p688_p4 = pnand %p687_p3, %p681_p0 }
   0xa   :  { %691 = shalt.err (!%p688_p4)
}
   0xb   :  { %s717_s12 = smov 64   ;;  %s718_s13 = smov 4  }
   0xc   :  { %41 = dma.hbm_to_vmem [thread:$0]  %s907_s7, 256, %s36_s10, [#allocation3], %s717_s12, %s717_s12, %s718_s13  }
   0xd   :  { %712 = dma.done.wait [#allocation3], 256  }
   0xe   :  { %713 = vsyncadd [#allocation3], 4294967040  ;;  %v719_v0 = vmov 0.0   ;;  %v638_v1 = vld [vmem:[%s901_s1 + $0x78] sm:$0xff]   ;;  %v640_v3 = vld [vmem:[%s901_s1 + $0x70] sm:$0xff]   ;;  %vm720_vm0 = vmmov 0  }
   0xf   :  { %592 = vmatprep.subr.bf16.mxu1 %v719_v0  ;;  %v639_v2 = vld [vmem:[%s901_s1 + $0x38] sm:$0xff]   ;;  %553 = vmatprep.subr.bf16.mxu0 %v638_v1  ;;  %v641_v4 = vld [vmem:[%s901_s1 + $0x30] sm:$0xff]   ;;  %v642_v5 = vld [vmem:[%s901_s1 + $0x68] sm:$0xff]   ;;  %vm381_vm1 = vcmask 523264   ;;  %vm455_vm2 = vcmask 261120  }
  0x10   :  { %554 = vmatpush3.bf16.msra.mxu0 %v639_v2  ;;  %v643_v6 = vld [vmem:[%s901_s1 + $0x28] sm:$0xff]   ;;  %v644_v7 = vld [vmem:[%s901_s1 + $0x60] sm:$0xff]   ;;  %v646_v9 = vld [vmem:[%s901_s1 + $0x58] sm:$0xff]   ;;  %608 = vmatprep.mubr.msk.bf16.mxu1 %vm720_vm0, %v719_v0 }
  0x11   :  { %555 = vmatprep.subr.bf16.mxu0 %v640_v3  ;;  %v645_v8 = vld [vmem:[%s901_s1 + $0x20] sm:$0xff]   ;;  %v647_v10 = vld [vmem:[%s901_s1 + $0x18] sm:$0xff]   ;;  %v648_v11 = vld [vmem:[%s901_s1 + $0x50] sm:$0xff]  }
  0x12   :  { %v49_v12 = vld [vmem:[%s900_s0 + $0x8] sm:$0xff]  ;;  %v654_v14 = vld [vmem:[%s903_s3 + $0x38] sm:$0xff]   ;;  %v649_v15 = vld [vmem:[%s901_s1 + $0x10] sm:$0xff]  }
  0x13   :  { %v51_v13 = vpack.c.bf16 %v49_v12, %v49_v12  ;;  %v650_v16 = vld [vmem:[%s901_s1 + $0x48] sm:$0xff]   ;;  %593 = vmatpush3.bf16.msra.mxu1 %v654_v14  ;;  %v655_v17 = vld [vmem:[%s903_s3 + $0x30] sm:$0xff]   ;;  %v652_v19 = vld [vmem:[%s901_s1 + $0x40] sm:$0xff]  }
  0x14   :  { %556 = vmatpush3.bf16.msra.mxu0 %v641_v4  ;;  %v651_v18 = vld [vmem:[%s901_s1 + $0x8] sm:$0xff]   ;;  %594 = vmatprep.subr.bf16.mxu1 %v719_v0  ;;  %v653_v21 = vld [vmem:[%s901_s1] sm:$0xff]   ;;  %v658_v25 = vld [vmem:[%s903_s3 + $0x18] sm:$0xff]  }
  0x15   :  { %557 = vmatprep.subr.bf16.mxu0 %v642_v5  ;;  %219 = vmatprep.mubr.bf16.mxu0 %v51_v13  ;;  %v656_v20 = vld [vmem:[%s903_s3 + $0x28] sm:$0xff]   ;;  %v48_v22 = vld [vmem:[%s900_s0] sm:$0xff]  ;;  %v659_v26 = vld [vmem:[%s903_s3 + $0x10] sm:$0xff]  }
  0x16   :  { %v657_v23 = vld [vmem:[%s903_s3 + $0x20] sm:$0xff]   ;;  %v50_v24 = vpack.c.bf16 %v48_v22, %v48_v22  ;;  %v660_v27 = vld [vmem:[%s903_s3 + $0x8] sm:$0xff]   ;;  %v662_v29 = vld [vmem:[%s905_s5 + $0x18] sm:$0xff]  }
  0x17   :  { %595 = vmatpush3.bf16.msra.mxu1 %v655_v17  ;;  %v661_v28 = vld [vmem:[%s903_s3] sm:$0xff]   ;;  %v663_v30 = vld [vmem:[%s905_s5 + $0x10] sm:$0xff]   ;;  %v664_v40 = vld [vmem:[%s905_s5 + $0x8] sm:$0xff]  }
  0x18   :  { %558 = vmatpush3.bf16.msra.mxu0 %v643_v6  ;;  %596 = vmatprep.subr.bf16.mxu1 %v719_v0  ;;  %v516_v32 = vld [vmem:[%s902_s2] ss:$0 sm:$0xff]  ;;  %v666_v50 = vld [vmem:[#allocation2 + $0x8] sm:$0xff]  }
  0x19   :  { %559 = vmatprep.subr.bf16.mxu0 %v644_v7  ;;  %v665_v41 = vld [vmem:[%s905_s5] sm:$0xff]  }
  0x1a   :  { %v533_v42 = vld [vmem:[%s904_s4] ss:$0 sm:$0xff] }
  0x1b   :  { %597 = vmatpush3.bf16.msra.mxu1 %v656_v20  ;;  %v667_v51 = vld [vmem:[#allocation2] sm:$0xff]  }
  0x1c   :  { %560 = vmatpush3.bf16.msra.mxu0 %v645_v8  ;;  %598 = vmatprep.subr.bf16.mxu1 %v719_v0  ;;  %v542_v52 = vld [vmem:[%s906_s6] ss:$0 sm:$0xff]  ;;  %s721_s6 = smov [#allocation5]  }
  0x1d   :  { %561 = vmatprep.subr.bf16.mxu0 %v646_v9  ;;  %v549_v63 = vld [vmem:[%s908_s8] ss:$0 sm:$0xff]  ;;  %s507_s12 = sshll.u32 %s721_s6, 4  ;;  %s508_s12 = int_to_ptr.vmem [resolvable:$true] %s507_s12 }
  0x1e   :  { %s692_s13 = scalar_lea.vmem %s508_s12, 64  ;;  %p697_p6 = scmp.lt.s32.totalorder %s508_s12, %s508_s12 }
  0x1f   :  { %599 = vmatpush3.bf16.msra.mxu1 %v657_v23  ;;  %p693_p5 = scmp.ne.s32.totalorder %s508_s12, %s692_s13  ;;  %p698_p7 = scmp.lt.s32.totalorder %s692_s13, %s692_s13 }
  0x20   :  { %562 = vmatpush3.bf16.msra.mxu0 %v647_v10  ;;  %600 = vmatprep.subr.bf16.mxu1 %v719_v0 }
  0x21   :  { %563 = vmatprep.subr.bf16.mxu0 %v648_v11  ;;  %p699_p8 = por %p698_p7, %p697_p6 }
  0x23   :  { %601 = vmatpush3.bf16.msra.mxu1 %v658_v25  ;;  %p700_p9 = pnand %p699_p8, %p693_p5 }
  0x24   :  { %564 = vmatpush3.bf16.msra.mxu0 %v649_v15  ;;  %602 = vmatprep.subr.bf16.mxu1 %v719_v0 }
  0x25   :  { %565 = vmatprep.subr.bf16.mxu0 %v650_v16 }
  0x27   :  { %603 = vmatpush3.bf16.msra.mxu1 %v659_v26 }
  0x28   :  { %566 = vmatpush3.bf16.msra.mxu0 %v651_v18  ;;  %604 = vmatprep.subr.bf16.mxu1 %v719_v0 }
  0x29   :  { %567 = vmatprep.subr.bf16.mxu0 %v652_v19 }
  0x2b   :  { %605 = vmatpush3.bf16.msra.mxu1 %v660_v27 }
  0x2c   :  { %568 = vmatpush3.bf16.msra.mxu0 %v653_v21  ;;  %606 = vmatprep.subr.bf16.mxu1 %v719_v0 }
  0x2d   :  { %612 = vmatprep.subr.bf16.mxu0 %v719_v0 }
  0x2f   :  { %220 = vmatmul.mubr.bf16.vlgmr.msra.gmra.mxu0 %v50_v24  ;;  %607 = vmatpush3.bf16.msra.mxu1 %v661_v28 }
  0x30   :  { %624 = vmatprep.subr.bf16.mxu1 %v719_v0  ;;  %620 = vmatprep.mubr.msk.bf16.mxu0 %vm720_vm0, %v719_v0 }
  0x31   :  { %613 = vmatpush3.bf16.msra.mxu0 %v662_v29 }
  0x32   :  { %614 = vmatprep.subr.bf16.mxu0 %v719_v0 }
  0x35   :  { %615 = vmatpush3.bf16.msra.mxu0 %v663_v30 }
  0x36   :  { %616 = vmatprep.subr.bf16.mxu0 %v719_v0 }
  0x39   :  { %617 = vmatpush3.bf16.msra.mxu0 %v664_v40 }
  0x3a   :  { %618 = vmatprep.subr.bf16.mxu0 %v719_v0 }
  0x3d   :  { %619 = vmatpush3.bf16.msra.mxu0 %v665_v41 }
  0xef   :  { %v569_v31 = vpop.f32.mrf.mxu0 }
  0xf1   :  { %v570_v33 = vpop.f32.mrf.mxu0 }
  0xf2   :  { %v571_v34 = vadd.f32 %v570_v33, %v569_v31 }
  0xf3   :  { %v572_v35 = vpop.f32.mrf.mxu0 }
  0xf4   :  { %v222_v36 = vadd.f32 %v571_v34, %v516_v32 }
  0xf5   :  { %v573_v37 = vpop.f32.mrf.mxu0 }
  0xf6   :  { %v227_v38 = vmax.f32 %v222_v36, 0.0 }
  0xf8   :  { %v228_v39 = vpack.c.bf16 %v227_v38, %v227_v38 }
  0xfa   :  { %609 = vmatmul.mubr.bf16.vlgmr.msra.gmra.mxu1 %v228_v39 }
  0xfb   :  { %628 = vmatprep.mubr.msk.bf16.mxu1 %vm720_vm0, %v719_v0  ;;  %625 = vmatpush3.bf16.msra.mxu1 %v666_v50 }
  0xfc   :  { %626 = vmatprep.subr.bf16.mxu1 %v719_v0 }
  0xff   :  { %627 = vmatpush3.bf16.msra.mxu1 %v667_v51 }
 0x1ba   :  { %v334_v43 = vpop.f32.mrf.mxu1 }
 0x1bb   :  { %v335_v44 = vadd.f32 %v533_v42, %v334_v43 }
 0x1bc   :  { %v610_v45 = vpop.f32.mrf.mxu1 }
 0x1bd   :  { %v340_v46 = vmax.f32 %v335_v44, 0.0 }
 0x1be   :  { %v337_v47 = vpop.f32.mrf.mxu1 }
 0x1bf   :  { %v341_v48 = vpack.c.bf16 %v340_v46, %v340_v46 }
 0x1c0   :  { %v611_v49 = vpop.f32.mrf.mxu1 }
 0x1c1   :  { %621 = vmatmul.mubr.msk.bf16.vlgmr.msra.gmra.mxu0 %vm381_vm1, %v341_v48 }
 0x281   :  { %v419_v53 = vpop.f32.mrf.mxu0 }
 0x282   :  { %v420_v54 = vadd.f32 %v542_v52, %v419_v53 }
 0x283   :  { %v622_v55 = vpop.f32.mrf.mxu0 }
 0x284   :  { %v548_v56 = vmul.f32 -1.442695, %v420_v54 }
 0x285   :  { %v422_v57 = vpop.f32.mrf.mxu0 }
 0x286   :  { %668 = vpow2.f32 %v548_v56 }
 0x287   :  { %v623_v58 = vpop.f32.mrf.mxu0 }
 0x293   :  { %v669_v59 = vpop.eup %668 }
 0x294   :  { %v428_v60 = vadd.f32 1.0, %v669_v59 }
 0x296   :  { %670 = vrcp.f32 %v428_v60 }
 0x2a3   :  { %v671_v61 = vpop.eup %670 }
 0x2a4   :  { %v431_v62 = vpack.c.bf16 %v671_v61, %v671_v61 }
 0x2a6   :  { %629 = vmatmul.mubr.msk.bf16.vlgmr.msra.gmra.mxu1 %vm455_vm2, %v431_v62 }
 0x366   :  { %v493_v0 = vpop.f32.mrf.mxu1 }
 0x367   :  { %v494_v1 = vadd.f32 %v549_v63, %v493_v0 }
 0x368   :  { %v630_v2 = vpop.f32.mrf.mxu1 }
 0x369   :  { %v499_v3 = vpack.c.bf16 %v494_v1, %v494_v1 }
 0x36a   :  { %v496_v4 = vpop.f32.mrf.mxu1 }
 0x36b   :  { %500 = vst [vmem:[#allocation5] sm:$0xf] %v499_v3 }
 0x36c   :  { %v631_v5 = vpop.f32.mrf.mxu1 }
 0x36d   :  { %703 = shalt.err (!%p700_p9)
}
 0x36e   :  { %510 = dma.vmem_to_hbm [thread:$0]  %s508_s12, 64, %s909_s9, [#allocation4]  }
 0x36f   :  { %714 = dma.done.wait [#allocation4], 64  }
 0x370   :  { %715 = vsyncadd [#allocation4], 4294967232 }
 0x371   :  { %514 = vsyncpa [#allocation3], 1 }
 0x372   :  { %515 = vsyncpa [#allocation4], 1 }

</bundles_post_ra>
